<compile_context>
chip_gen: v7x
topology: tpu7x:2x2x1
jax: 0.10.0
libtpu: 0.0.40
codegen_flags: <defaults>
</compile_context>

<pallas_src>
import functools

import jax
import jax.numpy as jnp
from jax.experimental import pallas as pl
from jax.experimental.pallas import tpu as pltpu

EPS = 1e-5
NEG_SLOPE = 0.2                  # nn.LeakyReLU(0.2) in the module
MATMUL_DTYPE = jnp.bfloat16      # MXU operand dtype (f32 accumulation)


# ----------------------------- kernel helpers -------------------------------


def _lrelu(a):
    return jnp.where(a > 0, a, NEG_SLOPE * a)


def _conv_taps(a, w_ref, b_ref, kernel_size, padding):
    """stride-1 ConvTranspose1d of `a` (Ci, L) with fused weight (Co, K*Ci).

    y[co, t] = sum_{k, c} W[c, co, k] * a[c, t + padding - k] + b[co]

    Implemented as a single MXU matmul: zero-pad `a` by `padding` along L,
    stack the K shifted slices along the channel (sublane) axis -> (K*Ci, L),
    contract over K*Ci.  Operands are bf16, accumulation is f32.
    """
    ci, l = a.shape
    if padding > 0:
        z = jnp.zeros((ci, padding), a.dtype)
        ap = jnp.concatenate([z, a, z], axis=1)               # (Ci, L + 2p)
    else:
        ap = a
    # tap k reads a[:, t + padding - k]  ->  padded-column offset 2*padding - k
    taps = [ap[:, 2 * padding - k: 2 * padding - k + l]
            for k in range(kernel_size)]
    stk = taps[0] if kernel_size == 1 else jnp.concatenate(taps, axis=0)
    y = jnp.dot(w_ref[...], stk.astype(w_ref.dtype),
                preferred_element_type=jnp.float32)           # (Co, L) f32
    return y + b_ref[...]


def _stage1_kernel(x_ref, sc1_ref, sh1_ref, w1_ref, b1_ref, y1_ref, *,
                   kernel_size, padding):
    # BN1 folded to scale/shift (global batch stats) + LeakyReLU + conv1.
    a = _lrelu(x_ref[...] * sc1_ref[...] + sh1_ref[...])      # (Ci, L) f32
    y1_ref[...] = _conv_taps(a, w1_ref, b1_ref, kernel_size, padding)


def _stage2_kernel(*refs, kernel_size, padding, out_act, project):
    if project:
        (y1_ref, x_ref, sc2_ref, sh2_ref, w2_ref, b2_ref,
         wp_ref, bp_ref, out_ref) = refs
    else:
        (y1_ref, x_ref, sc2_ref, sh2_ref, w2_ref, b2_ref, out_ref) = refs

    # BN2 (global stats, folded) + LeakyReLU + conv2.
    a = _lrelu(y1_ref[...] * sc2_ref[...] + sh2_ref[...])     # (Co, L) f32
    y = _conv_taps(a, w2_ref, b2_ref, kernel_size, padding)   # (Co, L) f32

    # residual: 1x1 transposed-conv projection when Cin != Cout, else identity
    if project:
        y = y + jnp.dot(wp_ref[...], x_ref[...].astype(wp_ref.dtype),
                        preferred_element_type=jnp.float32) + bp_ref[...]
    else:
        y = y + x_ref[...]
    if out_act:
        y = _lrelu(y)
    out_ref[...] = y.astype(out_ref.dtype)


def _pcall(kernel, grid, in_specs, out_specs, out_shape, flops, bytes_accessed):
    return pl.pallas_call(
        kernel,
        grid=grid,
        in_specs=in_specs,
        out_specs=out_specs,
        out_shape=out_shape,
        compiler_params=pltpu.CompilerParams(
            dimension_semantics=("parallel",),
            vmem_limit_bytes=32 * 1024 * 1024),
        cost_estimate=pl.CostEstimate(flops=int(flops), transcendentals=0,
                                      bytes_accessed=int(bytes_accessed)),
    )


# ------------------------------- wrapper ------------------------------------


def resblock_transpose(x_ncl, params, *, kernel_size, stride, padding,
                       out_act=True):
    """x_ncl: (N, Cin, L) float32.  Returns (N, Cout, L) float32 (NCL)."""
    assert stride == 1 and kernel_size - 2 * padding == 1, (
        "residual add requires a length-preserving transposed conv")
    n, cin, l = x_ncl.shape
    cout = params["w1"].shape[1]
    project = cin != cout
    f32 = jnp.float32
    x = x_ncl.astype(f32)

    def bn_scale_shift(t, gamma, beta):
        # training-mode BatchNorm1d: GLOBAL (N, L) stats, biased variance.
        mean = jnp.mean(t, axis=(0, 2))
        var = jnp.mean(jnp.square(t - mean[None, :, None]), axis=(0, 2))
        scale = gamma.astype(f32) * jax.lax.rsqrt(var + EPS)
        shift = beta.astype(f32) - mean * scale
        return scale[:, None], shift[:, None]                 # (C, 1)

    def fuse_w(w):                                            # (Ci,Co,K)->(Co,K*Ci)
        ci_, co_, k_ = w.shape
        return (jnp.transpose(w, (1, 2, 0))
                .reshape(co_, k_ * ci_).astype(MATMUL_DTYPE))

    def param_spec(shape):
        return pl.BlockSpec(shape, lambda i: (0,) * len(shape))

    def row_spec(c):
        return pl.BlockSpec((None, c, l), lambda i: (i, 0, 0))

    # ------------------ stage 1: y1 = conv1(act(bn1(x))) --------------------
    sc1, sh1 = bn_scale_shift(x, params["g1"], params["be1"])
    w1f = fuse_w(params["w1"])
    b1 = params["b1"].astype(f32)[:, None]
    k1 = functools.partial(_stage1_kernel,
                           kernel_size=kernel_size, padding=padding)
    flops1 = 2 * n * cout * l * (kernel_size * cin)
    bytes1 = 4 * (x.size + n * cout * l + sc1.size + sh1.size + b1.size) \
        + 2 * w1f.size
    y1 = _pcall(
        k1, (n,),
        [row_spec(cin), param_spec((cin, 1)), param_spec((cin, 1)),
         param_spec((cout, kernel_size * cin)), param_spec((cout, 1))],
        row_spec(cout),
        jax.ShapeDtypeStruct((n, cout, l), f32),
        flops1, bytes1,
    )(x, sc1, sh1, w1f, b1)

    # -------- stage 2: y = conv2(act(bn2(y1))) + residual [+ act] -----------
    sc2, sh2 = bn_scale_shift(y1, params["g2"], params["be2"])
    w2f = fuse_w(params["w2"])
    b2 = params["b2"].astype(f32)[:, None]

    args = [y1, x, sc2, sh2, w2f, b2]
    in_specs = [row_spec(cout), row_spec(cin), param_spec((cout, 1)),
                param_spec((cout, 1)),
                param_spec((cout, kernel_size * cout)), param_spec((cout, 1))]
    flops2 = 2 * n * cout * l * (kernel_size * cout)
    if project:
        wp = params["wp"][:, :, 0].T.astype(MATMUL_DTYPE)     # (Co, Ci)
        bp = params["bp"].astype(f32)[:, None]
        args += [wp, bp]
        in_specs += [param_spec((cout, cin)), param_spec((cout, 1))]
        flops2 += 2 * n * cout * l * cin
    bytes2 = 4 * (y1.size + x.size + 2 * n * cout * l) \
        + 2 * (w2f.size + (cout * cin if project else 0))

    k2 = functools.partial(_stage2_kernel, kernel_size=kernel_size,
                           padding=padding, out_act=out_act, project=project)
    y = _pcall(
        k2, (n,), in_specs, row_spec(cout),
        jax.ShapeDtypeStruct((n, cout, l), f32),
        flops2, bytes2,
    )(*args)
    return y


# --------------------------- pure-JAX reference -----------------------------


def _conv_t1d_ref(x, w, b, stride, padding):
    n, cin, l = x.shape
    _, cout, k = w.shape
    lout = (l - 1) * stride - 2 * padding + k
    y = jnp.zeros((n, cout, lout), jnp.float32)
    for tp in range(l):
        for kk in range(k):
            t = tp * stride - padding + kk
            if 0 <= t < lout:
                y = y.at[:, :, t].add(
                    jnp.einsum("ni,io->no", x[:, :, tp], w[:, :, kk],
                               precision=jax.lax.Precision.HIGHEST))
    return y + b[None, :, None]


def _bn_ref(x, g, b):
    mean = x.mean(axis=(0, 2), keepdims=True)
    var = ((x - mean) ** 2).mean(axis=(0, 2), keepdims=True)
    return (x - mean) / jnp.sqrt(var + EPS) * g[None, :, None] + b[None, :, None]


def _lrelu_ref(x):
    return jnp.where(x > 0, x, NEG_SLOPE * x)


def resblock_ref(x, params, *, kernel_size, stride, padding, out_act=True):
    y0 = x
    y = _conv_t1d_ref(_lrelu_ref(_bn_ref(x, params["g1"], params["be1"])),
                      params["w1"], params["b1"], stride, padding)
    y = _conv_t1d_ref(_lrelu_ref(_bn_ref(y, params["g2"], params["be2"])),
                      params["w2"], params["b2"], stride, padding)
    if x.shape[1] != params["w1"].shape[1]:
        y0 = _conv_t1d_ref(x, params["wp"], params["bp"], 1, 0)
    y = y + y0
    if out_act:
        y = _lrelu_ref(y)
    return y


# --------------------------------- main --------------------------------------


if __name__ == "__main__":
    K, STRIDE, PAD = 3, 1, 1

    def make_params(key, cin, cout, k, project):
        ks = jax.random.split(key, 11)
        p = dict(
            w1=0.1 * jax.random.normal(ks[0], (cin, cout, k), jnp.float32),
            b1=0.1 * jax.random.normal(ks[1], (cout,), jnp.float32),
            w2=0.1 * jax.random.normal(ks[2], (cout, cout, k), jnp.float32),
            b2=0.1 * jax.random.normal(ks[3], (cout,), jnp.float32),
            g1=1.0 + 0.1 * jax.random.normal(ks[4], (cin,), jnp.float32),
            be1=0.1 * jax.random.normal(ks[5], (cin,), jnp.float32),
            g2=1.0 + 0.1 * jax.random.normal(ks[6], (cout,), jnp.float32),
            be2=0.1 * jax.random.normal(ks[7], (cout,), jnp.float32),
        )
        if project:
            p["wp"] = 0.1 * jax.random.normal(ks[8], (cin, cout, 1), jnp.float32)
            p["bp"] = 0.1 * jax.random.normal(ks[9], (cout,), jnp.float32)
        return p, ks[10]

    key = jax.random.PRNGKey(0)
    configs = [
        dict(N=2, CIN=4, COUT=8, L=16, out_act=True),    # projected residual
        dict(N=2, CIN=8, COUT=8, L=16, out_act=False),   # identity residual
    ]
    for cfg in configs:
        key, sub = jax.random.split(key)
        params, xkey = make_params(sub, cfg["CIN"], cfg["COUT"], K,
                                   cfg["CIN"] != cfg["COUT"])
        x = jax.random.normal(xkey, (cfg["N"], cfg["CIN"], cfg["L"]),
                              jnp.float32)

        y = resblock_transpose(x, params, kernel_size=K, stride=STRIDE,
                               padding=PAD, out_act=cfg["out_act"])
        y = jax.block_until_ready(y)

        y_ref = resblock_ref(x, params, kernel_size=K, stride=STRIDE,
                             padding=PAD, out_act=cfg["out_act"])
        assert y.shape == (cfg["N"], cfg["COUT"], cfg["L"]), y.shape
        max_err = float(jnp.max(jnp.abs(y - y_ref)))
        # kernel matmuls use bf16 operands / f32 accumulation (per perf
        # review); reference is full f32 HIGHEST, hence the 3e-2 tolerance.
        assert jnp.allclose(y, y_ref, atol=3e-2, rtol=3e-2), max_err

    print("KERNEL_OK")
</pallas_src>

<mosaic_0001>
module attributes {stable_mosaic.version = 11 : i64} {
  func.func @_stage1_kernel(%arg0: i32, %arg1: memref<1x4x16xf32, #tpu.memory_space<vmem>>, %arg2: memref<4x1xf32, #tpu.memory_space<vmem>>, %arg3: memref<4x1xf32, #tpu.memory_space<vmem>>, %arg4: memref<8x12xbf16, #tpu.memory_space<vmem>>, %arg5: memref<8x1xf32, #tpu.memory_space<vmem>>, %arg6: memref<1x8x16xf32, #tpu.memory_space<vmem>>) attributes {dimension_semantics = [#tpu.dimension_semantics<parallel>], iteration_bounds = array<i64: 2>, scalar_prefetch = 0 : i64, scratch_operands = 0 : i64, tpu.core_type = #tpu.core_type<tc>, window_params = [{transform_indices = @transform_0, window_bounds = array<i64: 1, 4, 16>}, {pipeline_mode = #tpu.pipeline_mode<synchronous>, transform_indices = @transform_1, window_bounds = array<i64: 4, 1>}, {pipeline_mode = #tpu.pipeline_mode<synchronous>, transform_indices = @transform_2, window_bounds = array<i64: 4, 1>}, {pipeline_mode = #tpu.pipeline_mode<synchronous>, transform_indices = @transform_3, window_bounds = array<i64: 8, 12>}, {pipeline_mode = #tpu.pipeline_mode<synchronous>, transform_indices = @transform_4, window_bounds = array<i64: 8, 1>}, {transform_indices = @transform_5, window_bounds = array<i64: 1, 8, 16>}]} {
    %c0 = arith.constant 0 : index
    %c0_0 = arith.constant 0 : index
    %c0_1 = arith.constant 0 : index
    %0 = vector.load %arg1[%c0, %c0_0, %c0_1] : memref<1x4x16xf32, #tpu.memory_space<vmem>>, vector<1x4x16xf32>
    %1 = vector.shape_cast %0 : vector<1x4x16xf32> to vector<4x16xf32>
    %c0_2 = arith.constant 0 : index
    %c0_3 = arith.constant 0 : index
    %2 = vector.load %arg2[%c0_2, %c0_3] : memref<4x1xf32, #tpu.memory_space<vmem>>, vector<4x1xf32>
    %3 = vector.broadcast %2 : vector<4x1xf32> to vector<4x16xf32>
    %4 = arith.mulf %1, %3 : vector<4x16xf32>
    %c0_4 = arith.constant 0 : index
    %c0_5 = arith.constant 0 : index
    %5 = vector.load %arg3[%c0_4, %c0_5] : memref<4x1xf32, #tpu.memory_space<vmem>>, vector<4x1xf32>
    %6 = vector.broadcast %5 : vector<4x1xf32> to vector<4x16xf32>
    %7 = arith.addf %4, %6 : vector<4x16xf32>
    %cst = arith.constant 0.000000e+00 : f32
    %8 = vector.broadcast %cst : f32 to vector<4x16xf32>
    %9 = arith.cmpf ogt, %7, %8 : vector<4x16xf32>
    %cst_6 = arith.constant 2.000000e-01 : f32
    %10 = vector.broadcast %cst_6 : f32 to vector<4x16xf32>
    %11 = arith.mulf %10, %7 : vector<4x16xf32>
    %12 = arith.select %9, %7, %11 : vector<4x16xi1>, vector<4x16xf32>
    %cst_7 = arith.constant 0.000000e+00 : f32
    %13 = vector.broadcast %cst_7 : f32 to vector<4x1xf32>
    %14 = tpu.concatenate %13, %12, %13 in 1 : vector<4x1xf32>, vector<4x16xf32>, vector<4x1xf32> -> vector<4x18xf32>
    %15 = vector.extract_strided_slice %14 {offsets = [0, 2], sizes = [4, 16], strides = [1, 1]} : vector<4x18xf32> to vector<4x16xf32>
    %16 = vector.extract_strided_slice %14 {offsets = [0, 1], sizes = [4, 16], strides = [1, 1]} : vector<4x18xf32> to vector<4x16xf32>
    %17 = vector.extract_strided_slice %14 {offsets = [0, 0], sizes = [4, 16], strides = [1, 1]} : vector<4x18xf32> to vector<4x16xf32>
    %18 = tpu.concatenate %15, %16, %17 in 0 : vector<4x16xf32>, vector<4x16xf32>, vector<4x16xf32> -> vector<12x16xf32>
    %c0_8 = arith.constant 0 : index
    %c0_9 = arith.constant 0 : index
    %19 = vector.load %arg4[%c0_8, %c0_9] : memref<8x12xbf16, #tpu.memory_space<vmem>>, vector<8x12xbf16>
    %20 = arith.truncf %18 : vector<12x16xf32> to vector<12x16xbf16>
    %cst_10 = arith.constant dense<0.000000e+00> : vector<8x16xf32>
    %21 = tpu.matmul %19, %20, %cst_10 {dimension_numbers = #tpu.dot_dimension_numbers<[1], [0], [0], [1], [0, 0, 1, 1], [], []>} : vector<8x12xbf16>, vector<12x16xbf16>, vector<8x16xf32> -> vector<8x16xf32>
    %c0_11 = arith.constant 0 : index
    %c0_12 = arith.constant 0 : index
    %22 = vector.load %arg5[%c0_11, %c0_12] : memref<8x1xf32, #tpu.memory_space<vmem>>, vector<8x1xf32>
    %23 = vector.broadcast %22 : vector<8x1xf32> to vector<8x16xf32>
    %24 = arith.addf %21, %23 : vector<8x16xf32>
    %c0_13 = arith.constant 0 : index
    %c0_14 = arith.constant 0 : index
    %c0_15 = arith.constant 0 : index
    %25 = vector.load %arg6[%c0_13, %c0_14, %c0_15] : memref<1x8x16xf32, #tpu.memory_space<vmem>>, vector<1x8x16xf32>
    %26 = vector.shape_cast %25 : vector<1x8x16xf32> to vector<8x16xf32>
    %27 = vector.shape_cast %24 : vector<8x16xf32> to vector<1x8x16xf32>
    tpu.vector_store %arg6[%c0_13, %c0_14, %c0_15], %27 {strides = array<i32>} : memref<1x8x16xf32, #tpu.memory_space<vmem>>, vector<1x8x16xf32>,
    return
  }
  func.func @transform_0(%arg0: i32) -> (i32, i32, i32) {
    %c0_i32 = arith.constant 0 : i32
    %c0_i32_0 = arith.constant 0 : i32
    %c0_i32_1 = arith.constant 0 : i32
    return %arg0, %c0_i32, %c0_i32_0 : i32, i32, i32
  }
  func.func @transform_1(%arg0: i32) -> (i32, i32) {
    %c0_i32 = arith.constant 0 : i32
    %c0_i32_0 = arith.constant 0 : i32
    %c0_i32_1 = arith.constant 0 : i32
    return %c0_i32, %c0_i32_0 : i32, i32
  }
  func.func @transform_2(%arg0: i32) -> (i32, i32) {
    %c0_i32 = arith.constant 0 : i32
    %c0_i32_0 = arith.constant 0 : i32
    %c0_i32_1 = arith.constant 0 : i32
    return %c0_i32, %c0_i32_0 : i32, i32
  }
  func.func @transform_3(%arg0: i32) -> (i32, i32) {
    %c0_i32 = arith.constant 0 : i32
    %c0_i32_0 = arith.constant 0 : i32
    %c0_i32_1 = arith.constant 0 : i32
    return %c0_i32, %c0_i32_0 : i32, i32
  }
  func.func @transform_4(%arg0: i32) -> (i32, i32) {
    %c0_i32 = arith.constant 0 : i32
    %c0_i32_0 = arith.constant 0 : i32
    %c0_i32_1 = arith.constant 0 : i32
    return %c0_i32, %c0_i32_0 : i32, i32
  }
  func.func @transform_5(%arg0: i32) -> (i32, i32, i32) {
    %c0_i32 = arith.constant 0 : i32
    %c0_i32_0 = arith.constant 0 : i32
    %c0_i32_1 = arith.constant 0 : i32
    return %arg0, %c0_i32, %c0_i32_0 : i32, i32, i32
  }
}

</mosaic_0001>

<bundles_post_ra>
// kernel: tpu_custom_call.1
= control target key start
LH: loop header
LB: loop body
LE: loop exit
PB: predicated region body
PF: predicated region fallthrough
CT: control target
= control target key end

     0   :  { %10 = vsyncpa [#allocation3], 0  ;;  %s669_s0 = inlined_call_operand.vmem [shape: f32[2,4,16], index: 0, kind: input, shape index: {}]   ;;  %s670_s1 = inlined_call_operand.vmem [shape: f32[4,1], index: 1, kind: input, shape index: {}]   ;;  %s671_s2 = inlined_call_operand.vmem [shape: f32[4,1], index: 2, kind: input, shape index: {}]   ;;  %s672_s3 = inlined_call_operand.vmem [shape: bf16[8,12], index: 3, kind: input, shape index: {}]   ;;  %s673_s4 = inlined_call_operand.vmem [shape: f32[8,1], index: 4, kind: input, shape index: {}]   ;;  %s674_s5 = inlined_call_operand.hbm [shape: f32[2,8,16], index: 5, kind: output, shape index: {}]  }
   0x1   :  { %12 = vsyncpa [#allocation3 + $0x1], 0  ;;  %s557_s18 = smov 0   ;;  %s559_s19 = smov 0  }
   0x2   :  { %s561_s20 = smov 0   ;;  %s563_s21 = smov 0  }
   0x3 LB: > { %s578_s22 = sadd.s32 4294967295, %s518_s21   ;;  %s391_s23 = sadd.s32 4294967294, %s518_s21   ;;  %s518_s21 = sphi %s563_s21, %s680_s21   ;;  %s514_s20 = sphi %s561_s20, %s679_s20   ;;  %s510_s19 = sphi %s559_s19, %s678_s19   ;;  %s506_s18 = sphi %s557_s18, %s677_s18  }
   0x4   : > { %s582_s24 = sadd.s32 1, %s518_s21   ;;  %s135_s25 = sadd.s32 1, %s514_s20 }
   0x5   : > { %s132_s26 = ssub.s32 %s518_s21, %s582_s24  ;;  %p145_p0 = scmp.ne.s32.totalorder %s514_s20, %s510_s19 }
   0x6   : > { %p133_p1 = scmp.eq.s32.totalorder %s132_s26, 0  ;;  %p146_p2 = scmp.eq.s32.totalorder %s578_s22, 1 }
   0x7   : > { %p151_p3 = scmp.ne.s32.totalorder %s510_s19, %s506_s18  ;;  %p152_p4 = scmp.eq.s32.totalorder %s391_s23, 1 }
   0x8   : > { %s593_s27 = scalar_select %p133_p1, %s514_s20, %s135_s25  }
   0x9   : > { %p595_p5 = por %p146_p2, %p145_p0  ;;  %p599_p6 = por %p152_p4, %p151_p3 }
   0xa   : > { %p394_p7 = scmp.ge.s32.totalorder %s518_s21, 1  ;;  %p189_p8 = scmp.lt.s32.totalorder %s518_s21, 3 }
   0xc   : > { %p190_p9 = pnand %p394_p7, %p189_p8 }
   0xd   : > { %v222_v0 = vld [vmem:[%s670_s1] sm:$0xf] (!%p190_p9)  ;;  %v520_v1 = vmov (!%p190_p9), 0   ;;  %p216_p10 = scmp.lt.s32.totalorder (!%p190_p9), %s578_s22, 1  ;;  %s521_s14 = smov (!%p190_p9), 1   ;;  %vm243_vm1 = vcmask (!%p190_p9), 7168  }
   0xe   : > { %193 = sbr.rel (%p190_p9) target bundleno = 736 (0x2e0), region = 40  ;;  %455 = vset.pattern.permute.xlu0 (!%p190_p9), %v520_v1  ;;  %v229_v2 = vld [vmem:[%s671_s2] sm:$0xf] (!%p190_p9)  ;;  %vm245_vm2 = vcmask (!%p190_p9), 138240   ;;  %s522_s15 = smov (!%p190_p9), 2   ;;  %v523_v15 = vmov (!%p190_p9), 0.0  }
   0xf   : > { %225 = vperm.xlu0 (!%p190_p9), %455, %v222_v0   ;;  %v259_v14 = vld [vmem:[%s673_s4] sm:$0xff] (!%p190_p9)  ;;  %404 = vmatprep.subr.bf16.mxu0 (!%p190_p9), %v523_v15  ;;  %vm524_vm3 = vmmov (!%p190_p9), 0   ;;  %vm255_vm4 = vcmask (!%p190_p9), 1043456   ;;  %s525_s23 = smov (!%p190_p9), 126   ;;  %vm272_vm5 = vcmask (!%p190_p9), 1045504   ;;  %vm268_vm6 = vcmask (!%p190_p9), 97280  }
  0x10   : > { %406 = vmatprep.mubr.msk.bf16.mxu0 (!%p190_p9), %vm524_vm3, %v523_v15  ;;  %v257_v22 = vld [vmem:[%s672_s3] sm:$0xf] (!%p190_p9)  ;;  %s213_s30 = sand.u32 (!%p190_p9), 1, %s510_s19   ;;  %s399_s7 = sshll.u32 (!%p190_p9), %s578_s22, 7  ;;  %vm316_vm7 = vcmask (!%p190_p9), 130048  }
  0x11   : > { %s395_s6 = sshll.u32 (!%p190_p9), %s213_s30, 3  ;;  %s627_s12 = scalar_lea.hbm (!%p190_p9), %s674_s5, %s399_s7 }
  0x12   : > { %s215_s8 = scalar_lea.vmem (!%p190_p9), [#allocation2], %s395_s6 }
  0x13   : > { %232 = vperm.xlu0 (!%p190_p9), %455, %v229_v2  }
  0x15   : > { %s217_s9 = scalar_select %p216_p10, %s578_s22, 1 }
  0x16   : > { %s319_s22 = scalar_lea.sflag [#allocation3], %s213_s30 }
  0x17   : > { %s396_s10 = sshll.u32 %s217_s9, 2  ;;  %s332_s9 = sshll.u32 %s215_s8, 4  ;;  %s629_s9 = int_to_ptr.vmem [resolvable:$true] %s332_s9 }
  0x18   : > { %s219_s13 = scalar_lea.vmem %s669_s0, %s396_s10 }
  0x19   : > { %v221_v4 = vld [vmem:[%s219_s13] sm:$0xf]  ;;  %s456_s13 = scalar_lea.vmem %s629_s9, 128 }
  0x1a   : > { %p457_p11 = scmp.ne.s32.totalorder %s629_s9, %s456_s13 }
  0x1c   : > { %p458_p12 = pnand %p457_p11, %p595_p5 }
  0x1e   : > { %p459_p13 = pneg %p458_p12 }
  0x8e   : > { %v226_v3 = vpop.permute.xlu0 %225 }
  0x8f   : > { %v228_v5 = vmul.f32 %v226_v3, %v221_v4 }
  0x92   : > { %v233_v6 = vpop.permute.xlu0 %232 }
  0x93   : > { %v235_v7 = vadd.f32 %v233_v6, %v228_v5 }
  0x95   : > { %vm236_vm0 = vcmp.gt.f32.partialorder %v235_v7, 0.0  ;;  %v237_v8 = vmul.f32 0.2, %v235_v7 }
  0x97   : > { %v238_v9 = vsel %vm236_vm0, %v235_v7, %v237_v8 }
  0x98   : > { %240 = vrot.lane.b32.xlu1 %v238_v9, %s521_s14 }
 0x10a   : > { %v241_v10 = vpop.permute.xlu1 %240 }
 0x10b   : > { %v244_v11 = vsel %vm243_vm1, 0.0, %v241_v10 }
 0x10c   : > { %v246_v12 = vsel %vm245_vm2, %v244_v11, 0.0 }
 0x10d   : > { %v248_v13 = vrot.slane %v246_v12, 4  ;;  %252 = vrot.lane.b32.xlu0 %v246_v12, %s522_s15 }
 0x10f   : > { %249 = vrot.lane.b32.xlu1 %v248_v13, %s521_s14  ;;  %s526_s14 = smov [#allocation2]  }
 0x110   : > { %s460_s15 = sshll.u32 %s526_s14, 4  ;;  %s461_s15 = int_to_ptr.vmem [resolvable:$false] %s460_s15 }
 0x111   : > { %262 = vperm.xlu0 %455, %v259_v14   ;;  %s462_s16 = scalar_lea.vmem %s461_s15, 256  ;;  %p463_p0 = scmp.lt.s32.totalorder %s629_s9, %s461_s15 }
 0x112   : > { %p464_p1 = scmp.lt.s32.totalorder %s462_s16, %s456_s13 }
 0x114   : > { %p465_p2 = por %p464_p1, %p463_p0 }
 0x116   : > { %p466_p3 = pnand %p465_p2, %p459_p13 }
 0x17f   : > { %v253_v17 = vpop.permute.xlu0 %252 }
 0x181   : > { %v250_v16 = vpop.permute.xlu1 %249 }
 0x182   : > { %v256_v18 = vsel %vm255_vm4, %v246_v12, %v250_v16 }
 0x183   : > { %v258_v19 = vpack.c.bf16 %v253_v17, %v256_v18 }
 0x185   : > { %266 = vrot.lane.b32.xlu1 %v258_v19, %s525_s23 }
 0x190   : > { %v263_v23 = vpop.permute.xlu0 %262 }
 0x1f7   : > { %v267_v20 = vpop.permute.xlu1 %266 }
 0x1f8   : > { %v274_v21 = vsel %vm272_vm5, %v267_v20, 0 }
 0x1f9   : > { %405 = vmatpush3.bf16.msra.mxu0 %v274_v21 }
 0x1fc   : > { %407 = vmatmul.mubr.msk.bf16.vlgmr.msra.gmra.mrb[0].mxu0 %vm268_vm6, %v257_v22 }
 0x2cf   : > { %v310_v24 = vpop.f32.mrb[0].mxu0 }
 0x2d0   : > { %v311_v25 = vadd.f32 %v310_v24, %v263_v23  ;;  %v408_v26 = vpop.f32.mrb[1].mxu0 }
 0x2d1   : > { %v313_v27 = vpop.f32.mrb[2].mxu0 }
 0x2d2   : > { %v409_v28 = vpop.f32.mrb[3].mxu0  ;;  %317 = vst.msk [vmem:[%s215_s8] sm:$0xff] %vm316_vm7, %v311_v25 }
 0x2d3   : > { %469 = shalt.err (!%p466_p3)
}
 0x2d4   : > { %s470_s17 = scalar_lea.hbm %s627_s12, 128  ;;  %s474_s26 = scalar_lea.hbm %s674_s5, 256 }
 0x2d5   : > { %p471_p4 = scmp.ne.s32.totalorder %s627_s12, %s470_s17  ;;  %p475_p9 = scmp.lt.u32.totalorder %s627_s12, %s674_s5 }
 0x2d6   : > { %p476_p10 = scmp.lt.u32.totalorder %s474_s26, %s470_s17  ;;  %p478_p12 = scmp.lt.u32.totalorder %s470_s17, %s627_s12 }
 0x2d7   : > { %p472_p7 = pnand %p471_p4, %p595_p5 }
 0x2d8   : > { %p477_p11 = por %p476_p10, %p475_p9 }
 0x2d9   : > { %p473_p8 = pneg %p472_p7 }
 0x2da   : > { %p479_p13 = por %p478_p12, %p477_p11 }
 0x2dc   : > { %p480_p0 = pnand %p479_p13, %p473_p8 }
 0x2de   : > { %483 = shalt.err (!%p480_p0)
}
 0x2df   : > { %410 = dma.vmem_to_hbm [thread:$0]  (%p595_p5), %s629_s9, 128, %s627_s12, %s319_s22  }
 0x2e0 PF: > { %p416_p1 = scmp.ge.s32.totalorder %s518_s21, 2  ;;  %s344_s7 = sand.u32 1, %s506_s18  }
 0x2e1   : > { %s345_s8 = scalar_lea.sflag [#allocation3], %s344_s7 }
 0x2e2   : > { %p413_p2 = pnand %p416_p1, %p599_p6 }
 0x2e4   : > { %501 = dma.done.wait (!%p413_p2), %s345_s8, 128  }
 0x2e5   : > { %503 = vsyncadd (!%p413_p2), %s345_s8, 4294967168  ;;  %p15_p3 = scmp.ge.s32.totalorder %s582_s24, 4   ;;  %s677_s18 = smov %s510_s19 }
 0x2e6   : > { %s678_s19 = smov %s514_s20  ;;  %s679_s20 = smov %s593_s27 }
 0x2e7   : > { %s680_s21 = smov %s582_s24  ;;  %17 = sbr.rel (!%p15_p3) target bundleno = 3 (0x3), region = 75 }
 0x2ee   :  { %350 = vsyncpa [#allocation3], 1 }
 0x2ef   :  { %352 = vsyncpa [#allocation3 + $0x1], 1 }

</bundles_post_ra>
